<compile_context>
chip_gen: v7x
topology: tpu7x:2x2x1
jax: 0.10.0
libtpu: 0.0.40
codegen_flags: <defaults>
</compile_context>

<pallas_src>
import math
from functools import partial

import jax
import jax.numpy as jnp
from jax.experimental import pallas as pl
from jax.experimental.pallas import tpu as pltpu


# ----------------------------------------------------------------------------
# Parameter (buffer) construction — mirrors PositionalEncoding.__init__
# ----------------------------------------------------------------------------
def make_pe_table(d_model: int, max_len: int = 5000) -> jnp.ndarray:
    """pe[max_len, 1, d_model] with sin on even dims, cos on odd dims."""
    assert d_model % 2 == 0, "make_pe_table requires an even d_model"
    position = jnp.arange(max_len, dtype=jnp.float32)[:, None]          # (L, 1)
    div_term = jnp.exp(
        jnp.arange(0, d_model, 2, dtype=jnp.float32)
        * (-math.log(10000.0) / d_model)
    )                                                                    # (D/2,)
    angles = position * div_term                                         # (L, D/2)
    pe = jnp.zeros((max_len, d_model), dtype=jnp.float32)
    pe = pe.at[:, 0::2].set(jnp.sin(angles))
    pe = pe.at[:, 1::2].set(jnp.cos(angles))
    return pe[:, None, :]                                                # (L, 1, D)


# ----------------------------------------------------------------------------
# Pallas kernel: out[S, B*D] = x[S, B*D] + pe (broadcast over batch, f32 add)
# ----------------------------------------------------------------------------
def _pe_add_kernel(x_ref, pe_ref, o_ref, *, batch: int, d_model: int):
    # x_ref / o_ref : (tile_s, B*D)  lane-dense block
    # pe_ref        : (tile_s, D)    f32 (size-1 batch dim squeezed by BlockSpec)
    pe = pe_ref[...].astype(jnp.float32)          # loaded once per block
    for b in range(batch):                        # static unroll: no (tile_s, B*D) temp
        sl = slice(b * d_model, (b + 1) * d_model)
        o_ref[:, sl] = (x_ref[:, sl].astype(jnp.float32) + pe).astype(o_ref.dtype)


# ----------------------------------------------------------------------------
# Tiling heuristics
# ----------------------------------------------------------------------------
_VMEM_SOFT_CAP = 40 << 20     # budget for the pipelined block footprint
_VMEM_LIMIT_CAP = 48 << 20    # never request more scoped VMEM (v7x physical = 64 MiB)


def _sublane_multiple(dtype) -> int:
    # f32 -> 8, bf16/f16 -> 16, int8/fp8 -> 32 (packed sublanes in a vreg).
    return max(8, 32 // jnp.dtype(dtype).itemsize)


def _device_kind() -> str:
    try:
        return jax.devices()[0].device_kind.lower()
    except Exception:
        return ""


def _target_block_bytes(kind: str) -> int:
    if "v7" in kind:   # ~3.2 TB/s: amortize 0.35 us/step overhead; 64 MiB VMEM
        return 6 << 20
    if "v6" in kind:   # ~1.4 TB/s, 32 MiB default scoped VMEM
        return 4 << 20
    if "v5" in kind:   # ~0.8 TB/s, 16 MiB default scoped VMEM
        return 2 << 20
    return 4 << 20


def _round_down(v: int, m: int) -> int:
    return max(m, (v // m) * m)


def _pick_seq_tile(seq_len: int, x_row_bytes: int, pe_row_bytes: int,
                   sub: int, target_block_bytes: int) -> int:
    rows = max(sub, target_block_bytes // max(x_row_bytes, 1))
    if rows < seq_len:
        # Tensor spans several blocks: keep >= ~4 grid steps so DMA-in, the
        # add, and writeback actually overlap in the software pipeline.
        rows = min(rows, _round_down(pl.cdiv(seq_len, 4), sub))
        rows = _round_down(rows, sub)
    rows = min(rows, seq_len)
    # VMEM budget guard: 2 pipeline buffers each for x, out and pe blocks.
    per_row = 2 * (2 * x_row_bytes + pe_row_bytes)
    max_rows = max(sub, _VMEM_SOFT_CAP // max(per_row, 1))
    if rows > max_rows:
        rows = min(seq_len, _round_down(max_rows, sub))
    return rows


# ----------------------------------------------------------------------------
# Forward wrapper
# ----------------------------------------------------------------------------
def positional_encoding_forward(x: jnp.ndarray, pe: jnp.ndarray,
                                *, seq_tile: int | None = None) -> jnp.ndarray:
    """x: [S, B, D].  pe: [max_len, 1, D] (kept in its stored dtype, f32)."""
    S, B, D = x.shape
    max_len = pe.shape[0]
    assert S <= max_len, f"seq_len={S} exceeds positional table max_len={max_len}"
    assert pe.shape[1] == 1 and pe.shape[2] == D, "pe must be [max_len, 1, d_model]"

    kind = _device_kind()
    sub = _sublane_multiple(x.dtype)
    x_row_bytes = B * D * x.dtype.itemsize
    pe_row_bytes = D * pe.dtype.itemsize
    per_row = 2 * (2 * x_row_bytes + pe_row_bytes)

    if seq_tile is None:
        seq_tile = _pick_seq_tile(S, x_row_bytes, pe_row_bytes, sub,
                                  _target_block_bytes(kind))
    else:
        seq_tile = min(seq_tile, S)
        if seq_tile < S:
            seq_tile = _round_down(seq_tile, sub)
        # Guard user-passed tiles against blowing the VMEM budget.
        max_rows = max(sub, _VMEM_SOFT_CAP // max(per_row, 1))
        if seq_tile > max_rows:
            seq_tile = min(S, _round_down(max_rows, sub))

    # Lane-dense 2-D view of x (layout-preserving reshape).
    x2 = x.reshape(S, B * D)

    grid = (pl.cdiv(S, seq_tile),)               # ragged last block handled by Pallas

    footprint = seq_tile * per_row               # double-buffered x/out/pe blocks
    vmem_limit = int(min(_VMEM_LIMIT_CAP, max(16 << 20, footprint + (8 << 20))))

    if "v7" in kind:
        # Real 2-TensorCore sharding on v7x (string "parallel" does not split).
        dim_sem = (getattr(pltpu, "CORE_PARALLEL", "parallel"),)
    else:
        dim_sem = ("parallel",)

    out2 = pl.pallas_call(
        partial(_pe_add_kernel, batch=B, d_model=D),
        out_shape=jax.ShapeDtypeStruct((S, B * D), x.dtype),
        grid_spec=pltpu.PrefetchScalarGridSpec(
            num_scalar_prefetch=0,
            grid=grid,
            in_specs=[
                pl.BlockSpec((seq_tile, B * D), lambda i: (i, 0)),
                # Full pe buffer stays f32 in HBM; size-1 batch dim squeezed,
                # so the kernel sees a (seq_tile, D) block.
                pl.BlockSpec((seq_tile, None, D), lambda i: (i, 0, 0)),
            ],
            out_specs=pl.BlockSpec((seq_tile, B * D), lambda i: (i, 0)),
        ),
        compiler_params=pltpu.CompilerParams(
            dimension_semantics=dim_sem,
            vmem_limit_bytes=vmem_limit,
        ),
    )(x2, pe)

    return out2.reshape(S, B, D)


if __name__ == "__main__":
    # Small shapes consistent with the module: [seq_len, batch, d_model]
    seq_len, batch, d_model = 8, 2, 32
    max_len = 64  # small synthetic buffer (>= seq_len)

    key = jax.random.PRNGKey(0)
    x = jax.random.normal(key, (seq_len, batch, d_model), dtype=jnp.float32)
    pe = make_pe_table(d_model, max_len)      # deterministic "buffer" init

    out = jax.block_until_ready(positional_encoding_forward(x, pe))
    ref = x + pe[:seq_len]                    # eval-mode dropout == identity
    assert out.shape == (seq_len, batch, d_model)
    assert jnp.allclose(out, ref, atol=1e-6, rtol=1e-6)

    # Multi-tile grid (forces seq tiling + a ragged last block).
    S2, B2, D2 = 200, 4, 128
    x2 = jax.random.normal(jax.random.PRNGKey(1), (S2, B2, D2), dtype=jnp.float32)
    pe2 = make_pe_table(D2, 256)
    out2 = jax.block_until_ready(positional_encoding_forward(x2, pe2, seq_tile=64))
    assert jnp.allclose(out2, x2 + pe2[:S2], atol=1e-6, rtol=1e-6)

    # bf16 activations: pe stays f32 in HBM, add is done in f32 in-kernel.
    x3 = x2.astype(jnp.bfloat16)
    out3 = jax.block_until_ready(positional_encoding_forward(x3, pe2))
    ref3 = (x3.astype(jnp.float32) + pe2[:S2]).astype(jnp.bfloat16)
    assert out3.dtype == jnp.bfloat16
    assert jnp.allclose(out3.astype(jnp.float32), ref3.astype(jnp.float32),
                        atol=1e-2, rtol=1e-2)

    print("KERNEL_OK")
</pallas_src>

<mosaic_0001>
module attributes {stable_mosaic.version = 11 : i64} {
  func.func @_pe_add_kernel(%arg0: i32, %arg1: memref<8x64xf32, #tpu.memory_space<vmem>>, %arg2: memref<8x1x32xf32, #tpu.memory_space<vmem>>, %arg3: memref<8x64xf32, #tpu.memory_space<vmem>>) attributes {dimension_semantics = [#tpu.dimension_semantics<parallel>], iteration_bounds = array<i64: 1>, scalar_prefetch = 0 : i64, scratch_operands = 0 : i64, tpu.core_type = #tpu.core_type<tc>, window_params = [{transform_indices = @transform_0, window_bounds = array<i64: 8, 64>}, {transform_indices = @transform_1, window_bounds = array<i64: 8, 1, 32>}, {transform_indices = @transform_2, window_bounds = array<i64: 8, 64>}]} {
    %c0 = arith.constant 0 : index
    %c0_0 = arith.constant 0 : index
    %c0_1 = arith.constant 0 : index
    %0 = vector.load %arg2[%c0, %c0_0, %c0_1] : memref<8x1x32xf32, #tpu.memory_space<vmem>>, vector<8x1x32xf32>
    %1 = vector.shape_cast %0 : vector<8x1x32xf32> to vector<8x32xf32>
    %c0_2 = arith.constant 0 : index
    %c0_3 = arith.constant 0 : index
    %2 = vector.load %arg1[%c0_2, %c0_3] : memref<8x64xf32, #tpu.memory_space<vmem>>, vector<8x32xf32>
    %3 = arith.addf %2, %1 : vector<8x32xf32>
    %c0_4 = arith.constant 0 : index
    %c0_5 = arith.constant 0 : index
    %4 = vector.load %arg3[%c0_4, %c0_5] : memref<8x64xf32, #tpu.memory_space<vmem>>, vector<8x32xf32>
    tpu.vector_store %arg3[%c0_4, %c0_5], %3 {strides = array<i32>} : memref<8x64xf32, #tpu.memory_space<vmem>>, vector<8x32xf32>,
    %c0_6 = arith.constant 0 : index
    %c32 = arith.constant 32 : index
    %5 = vector.load %arg1[%c0_6, %c32] : memref<8x64xf32, #tpu.memory_space<vmem>>, vector<8x32xf32>
    %6 = arith.addf %5, %1 : vector<8x32xf32>
    %c0_7 = arith.constant 0 : index
    %c32_8 = arith.constant 32 : index
    %7 = vector.load %arg3[%c0_7, %c32_8] : memref<8x64xf32, #tpu.memory_space<vmem>>, vector<8x32xf32>
    tpu.vector_store %arg3[%c0_7, %c32_8], %6 {strides = array<i32>} : memref<8x64xf32, #tpu.memory_space<vmem>>, vector<8x32xf32>,
    return
  }
  func.func @transform_0(%arg0: i32) -> (i32, i32) {
    %c0_i32 = arith.constant 0 : i32
    %c0_i32_0 = arith.constant 0 : i32
    return %arg0, %c0_i32 : i32, i32
  }
  func.func @transform_1(%arg0: i32) -> (i32, i32, i32) {
    %c0_i32 = arith.constant 0 : i32
    %c0_i32_0 = arith.constant 0 : i32
    %c0_i32_1 = arith.constant 0 : i32
    return %arg0, %c0_i32, %c0_i32_0 : i32, i32, i32
  }
  func.func @transform_2(%arg0: i32) -> (i32, i32) {
    %c0_i32 = arith.constant 0 : i32
    %c0_i32_0 = arith.constant 0 : i32
    return %arg0, %c0_i32 : i32, i32
  }
}

</mosaic_0001>

<bundles_post_ra>
// kernel: tpu_custom_call.1
= control target key start
LH: loop header
LB: loop body
LE: loop exit
PB: predicated region body
PF: predicated region fallthrough
CT: control target
= control target key end

     0   :  { %v36_v1 = vlaneseq  ;;  %s187_s0 = inlined_call_operand.vmem [shape: f32[8,64], index: 0, kind: input, shape index: {}]   ;;  %s188_s1 = inlined_call_operand.vmem [shape: f32[64,1,32], index: 1, kind: input, shape index: {}]   ;;  %s189_s2 = inlined_call_operand.hbm [shape: f32[8,64], index: 2, kind: output, shape index: {}]  }
   0x1   :  { %v12_v0 = vld [vmem:[%s188_s1] sm:$0x1]  ;;  %v13_v2 = vld [vmem:[%s188_s1 + $0x1] sm:$0x1]  ;;  %v14_v3 = vld [vmem:[%s188_s1 + $0x2] sm:$0x1] }
   0x2   :  { %v15_v4 = vld [vmem:[%s188_s1 + $0x3] sm:$0x1]  ;;  %v16_v5 = vld [vmem:[%s188_s1 + $0x4] sm:$0x1]  ;;  %v17_v6 = vld [vmem:[%s188_s1 + $0x5] sm:$0x1] }
   0x3   :  { %v18_v7 = vld [vmem:[%s188_s1 + $0x6] sm:$0x1]  ;;  %v19_v8 = vld [vmem:[%s188_s1 + $0x7] sm:$0x1] }
   0x4   :  { %7 = vsyncpa [#allocation3], 0  ;;  %v130_v9 = vmov 1966171168   ;;  %v37_v11 = vshrl.u32 %v36_v1, 7  ;;  %v29_v12 = vcombine.low %v12_v0, %v13_v2  ;;  %v30_v13 = vcombine.low %v14_v3, %v15_v4  ;;  %v20_v26 = vld [vmem:[%s187_s0] sm:$0xff] }
   0x5   :  { %v34_v10 = vunpack.c.l.s4 %v130_v9  ;;  %v31_v14 = vcombine.low %v16_v5, %v17_v6  ;;  %v32_v15 = vcombine.low %v18_v7, %v19_v8  ;;  %vm80_vm0 = vcmask 261120   ;;  %s131_s26 = smov 32   ;;  %s132_s27 = smov [#allocation2]  }
   0x6   :  { %s95_s28 = sshll.u32 %s132_s27, 4  ;;  %vm87_vm1 = vcmask 523520   ;;  %s96_s28 = int_to_ptr.vmem [resolvable:$true] %s95_s28 }
   0x7   :  { %v35_v16 = vunpack.c.0.s8 %v34_v10  ;;  %s106_s29 = scalar_lea.vmem %s96_s28, 128  ;;  %p111_p1 = scmp.lt.s32.totalorder %s96_s28, %s96_s28 }
   0x8   :  { %p107_p0 = scmp.ne.s32.totalorder %s96_s28, %s106_s29  ;;  %p112_p2 = scmp.lt.s32.totalorder %s106_s29, %s106_s29 }
   0x9   :  { %v38_v17 = vsub.s32 %v35_v16, %v37_v11 }
   0xa   :  { %p113_p3 = por %p112_p2, %p111_p1 }
   0xb   :  { %v39_v18 = vrot.slane %v29_v12, %v38_v17  ;;  %v46_v19 = vrot.slane %v30_v13, %v38_v17  ;;  %v53_v20 = vrot.slane %v31_v14, %v38_v17  ;;  %v60_v21 = vrot.slane %v32_v15, %v38_v17 }
   0xc   :  { %p114_p4 = pnand %p113_p3, %p107_p0 }
   0xd   :  { %v61_v22 = vcombine.low %v39_v18, %v46_v19  ;;  %v62_v23 = vcombine.low %v53_v20, %v60_v21 }
   0xf   :  { %v69_v24 = vrot.slane %v61_v22, %v38_v17  ;;  %v76_v25 = vrot.slane %v62_v23, %v38_v17 }
  0x11   :  { %v77_v27 = vcombine.low %v69_v24, %v76_v25 }
  0x13   :  { %v79_v28 = vadd.f32 %v77_v27, %v20_v26  ;;  %83 = vrot.lane.b32.xlu0 %v77_v27, %s131_s26 }
  0x15   :  { %81 = vst.msk [vmem:[#allocation2] sm:$0xff] %vm80_vm0, %v79_v28 }
  0x85   :  { %v84_v29 = vpop.permute.xlu0 %83 }
  0x86   :  { %v86_v30 = vadd.f32 %v84_v29, %v20_v26 }
  0x88   :  { %88 = vst.msk [vmem:[#allocation2] sm:$0xff] %vm87_vm1, %v86_v30 }
  0x89   :  { %117 = shalt.err (!%p114_p4)
}
  0x8a   :  { %s118_s3 = scalar_lea.hbm %s189_s2, 128 }
  0x8b   :  { %p119_p5 = scmp.ne.s32.totalorder %s189_s2, %s118_s3  ;;  %p122_p6 = scmp.lt.u32.totalorder %s118_s3, %s189_s2 }
  0x8d   :  { %p124_p7 = pnand %p122_p6, %p119_p5 }
  0x8f   :  { %127 = shalt.err (!%p124_p7)
}
  0x90   :  { %98 = dma.vmem_to_hbm [thread:$0]  %s96_s28, 128, %s189_s2, [#allocation3]  }
  0x91   :  { %128 = dma.done.wait [#allocation3], 128  }
  0x92   :  { %129 = vsyncadd [#allocation3], 4294967168 }
  0x93   :  { %102 = vsyncpa [#allocation3], 1 }

</bundles_post_ra>
